<compile_context>
chip_gen: v7x
topology: tpu7x:2x2x1
jax: 0.10.0
libtpu: 0.0.40
codegen_flags: <defaults>
</compile_context>

<pallas_src>
import functools
import math

import jax
import jax.numpy as jnp
from jax.experimental import pallas as pl
from jax.experimental.pallas import tpu as pltpu


# Below this element count, pallas_call launch cost dominates one vreg of VPU
# work — plain jnp fuses into neighbors for free.
_PALLAS_MIN_SIZE = 1 << 20
# Above this per-array byte count the grid-free whole-array path risks the v5e
# ~16 MiB scoped-VMEM default (1 input + 2 outputs) — switch to a tiled grid.
_WHOLE_ARRAY_MAX_BYTES = 4 << 20
# (512, 128) f32 tile = 256 KiB per array; double-buffered 3 arrays ≈ 1.5 MiB,
# safe on v5e / v6e / v7x.
_TILE_ROWS = 512


def _grad_scale_kernel(scale_ref, out_ref, out_scaled_ref, *, use_sqrt, max_bound):
    s = scale_ref[...]
    # NOTE: use_sqrt=True means scale**2 (matches mtpq semantics despite the name).
    o = (s * s) if use_sqrt else jnp.abs(s)
    out_ref[...] = o
    # Second output rides the same vreg: VALU and vst slots are idle here.
    out_scaled_ref[...] = o * jnp.asarray(max_bound, dtype=o.dtype)


def _grad_scale_pallas(scale, *, use_sqrt, max_bound):
    orig_shape = scale.shape
    dtype = scale.dtype
    c = int(scale.size)
    kernel = functools.partial(
        _grad_scale_kernel, use_sqrt=use_sqrt, max_bound=float(max_bound))

    if c * dtype.itemsize <= _WHOLE_ARRAY_MAX_BYTES:
        # Grid-free whole-array path: no pipeline scaffolding, no lane padding
        # (whole-array blocks are exempt from the (8,128) divisibility rule).
        scale2d = scale.reshape(1, c)
        out2d, out_scaled2d = pl.pallas_call(
            kernel,
            out_shape=(jax.ShapeDtypeStruct(scale2d.shape, dtype),
                       jax.ShapeDtypeStruct(scale2d.shape, dtype)),
            in_specs=[pl.BlockSpec(memory_space=pltpu.MemorySpace.VMEM)],
            out_specs=(pl.BlockSpec(memory_space=pltpu.MemorySpace.VMEM),
                       pl.BlockSpec(memory_space=pltpu.MemorySpace.VMEM)),
        )(scale2d)
        return out2d.reshape(orig_shape), out_scaled2d.reshape(orig_shape)

    # Large-C path: sublane-dense (rows, 128) view (fills full (8,128) vregs),
    # 1-D parallel grid with small tiles so it streams on every generation.
    tile_elems = _TILE_ROWS * 128
    c_pad = ((c + tile_elems - 1) // tile_elems) * tile_elems
    flat = scale.reshape(-1)
    if c_pad != c:
        flat = jnp.pad(flat, (0, c_pad - c))
    scale2d = flat.reshape(-1, 128)
    grid = (scale2d.shape[0] // _TILE_ROWS,)
    spec = pl.BlockSpec((_TILE_ROWS, 128), lambda i: (i, 0))
    out2d, out_scaled2d = pl.pallas_call(
        kernel,
        out_shape=(jax.ShapeDtypeStruct(scale2d.shape, dtype),
                   jax.ShapeDtypeStruct(scale2d.shape, dtype)),
        grid=grid,
        in_specs=[spec],
        out_specs=(spec, spec),
        compiler_params=pltpu.CompilerParams(
            dimension_semantics=("parallel",)),
    )(scale2d)
    out = out2d.reshape(-1)[:c].reshape(orig_shape)
    out_scaled = out_scaled2d.reshape(-1)[:c].reshape(orig_shape)
    return out, out_scaled


class GradScale:
    """JAX/Pallas port of mtpq GradScale (forward only)."""

    def __init__(self, num_bits=8, unsigned=False, use_sqrt=False,
                 pallas_min_size=_PALLAS_MIN_SIZE):
        self.max_bound = 2.0 ** (num_bits - 1 + int(unsigned)) - 1.0
        self.sqrt_scale = use_sqrt
        self.pallas_min_size = pallas_min_size
        self._is_init = False
        self._grad_scale = None

    def __call__(self, inputs, scale):
        if not self._is_init:
            # Python float only — the forward never reads it, so no device
            # constant / H2D dispatch.  Mirrors the PyTorch one-time init.
            numel = int(inputs.size)
            self._grad_scale = 1.0 / math.sqrt(self.max_bound * numel)
            self._is_init = True
        # TODO(synk): QF.scalegrad backward (grad_scale * upstream grad) belongs
        # in a jax.custom_vjp around this forward, not a standalone Pallas kernel.

        if int(scale.size) < self.pallas_min_size:
            # Small per-channel scale: plain jnp fuses with neighboring ops;
            # a pallas_call here would only be a fusion barrier.
            out = scale * scale if self.sqrt_scale else jnp.abs(scale)
            out_scaled = out * jnp.asarray(self.max_bound, dtype=out.dtype)
            return out, out_scaled

        return _grad_scale_pallas(
            scale, use_sqrt=self.sqrt_scale, max_bound=self.max_bound)


if __name__ == "__main__":
    key = jax.random.PRNGKey(0)
    k_x, k_s = jax.random.split(key)

    # Small shapes consistent with a per-channel quantizer on an NCHW conv input.
    x = jax.random.normal(k_x, (2, 4, 16, 16), dtype=jnp.float32)   # NCHW
    scale = jax.random.normal(k_s, (4,), dtype=jnp.float32) * 0.1   # per-channel scale

    # Force the Pallas path (pallas_min_size=0) so the kernel itself runs.
    mod = GradScale(num_bits=8, unsigned=False, use_sqrt=False, pallas_min_size=0)
    out, out_scaled = mod(x, scale)
    jax.block_until_ready((out, out_scaled))

    ref_out = jnp.abs(scale)
    assert out.shape == scale.shape and out_scaled.shape == scale.shape
    assert jnp.allclose(out, ref_out, atol=1e-6), "outputs mismatch"
    assert jnp.allclose(out_scaled, ref_out * mod.max_bound, atol=1e-4), \
        "scaled outputs mismatch"

    # use_sqrt path (scale**2) through the Pallas kernel.
    mod_sq = GradScale(num_bits=8, unsigned=False, use_sqrt=True, pallas_min_size=0)
    out_sq, out_sq_scaled = mod_sq(x, scale)
    jax.block_until_ready((out_sq, out_sq_scaled))
    assert jnp.allclose(out_sq, scale * scale, atol=1e-6), "sqrt-path outputs mismatch"
    assert jnp.allclose(out_sq_scaled, scale * scale * mod_sq.max_bound, atol=1e-4), \
        "sqrt-path scaled outputs mismatch"

    # Default size-gated path (plain jnp at C=4) must agree with the kernel.
    mod_default = GradScale(num_bits=8, unsigned=False, use_sqrt=False)
    out_d, out_d_scaled = mod_default(x, scale)
    jax.block_until_ready((out_d, out_d_scaled))
    assert jnp.allclose(out_d, out, atol=1e-6), "gated-path outputs mismatch"
    assert jnp.allclose(out_d_scaled, out_scaled, atol=1e-4), "gated-path scaled mismatch"

    print("KERNEL_OK")
</pallas_src>

<mosaic_0001>
module attributes {stable_mosaic.version = 11 : i64} {
  func.func @_grad_scale_kernel(%arg0: memref<1x4xf32, #tpu.memory_space<vmem>>, %arg1: memref<1x4xf32, #tpu.memory_space<vmem>>, %arg2: memref<1x4xf32, #tpu.memory_space<vmem>>) attributes {dimension_semantics = [], scalar_prefetch = 0 : i64, scratch_operands = 0 : i64, tpu.core_type = #tpu.core_type<tc>} {
    %c0 = arith.constant 0 : index
    %c0_0 = arith.constant 0 : index
    %0 = vector.load %arg0[%c0, %c0_0] : memref<1x4xf32, #tpu.memory_space<vmem>>, vector<1x4xf32>
    %1 = math.absf %0 : vector<1x4xf32>
    %c0_1 = arith.constant 0 : index
    %c0_2 = arith.constant 0 : index
    %2 = vector.load %arg1[%c0_1, %c0_2] : memref<1x4xf32, #tpu.memory_space<vmem>>, vector<1x4xf32>
    tpu.vector_store %arg1[%c0_1, %c0_2], %1 {strides = array<i32>} : memref<1x4xf32, #tpu.memory_space<vmem>>, vector<1x4xf32>,
    %cst = arith.constant 1.270000e+02 : f32
    %3 = vector.broadcast %cst : f32 to vector<1x4xf32>
    %4 = arith.mulf %1, %3 : vector<1x4xf32>
    %c0_3 = arith.constant 0 : index
    %c0_4 = arith.constant 0 : index
    %5 = vector.load %arg2[%c0_3, %c0_4] : memref<1x4xf32, #tpu.memory_space<vmem>>, vector<1x4xf32>
    tpu.vector_store %arg2[%c0_3, %c0_4], %4 {strides = array<i32>} : memref<1x4xf32, #tpu.memory_space<vmem>>, vector<1x4xf32>,
    return
  }
}

</mosaic_0001>

<bundles_post_ra>
// kernel: tpu_custom_call.1
= control target key start
LH: loop header
LB: loop body
LE: loop exit
PB: predicated region body
PF: predicated region fallthrough
CT: control target
= control target key end

     0   :  { %8 = vsyncpa [#allocation3], 0  ;;  %s198_s0 = inlined_call_operand.hbm [shape: f32[1,4], index: 0, kind: input, shape index: {}]   ;;  %s199_s1 = inlined_call_operand.hbm [shape: f32[1,4], index: 1, kind: output, shape index: {0}]   ;;  %s200_s2 = inlined_call_operand.hbm [shape: f32[1,4], index: 2, kind: output, shape index: {1}]  }
   0x1   :  { %9 = vsyncpa [#allocation4], 0 }
   0x2   :  { %10 = vsyncpa [#allocation7], 0  ;;  %s134_s9 = smov [#allocation2]   ;;  %s62_s13 = scalar_lea.hbm %s198_s0, 16 }
   0x3   :  { %s17_s10 = sshll.u32 %s134_s9, 4  ;;  %p63_p0 = scmp.ne.s32.totalorder %s198_s0, %s62_s13  ;;  %s18_s10 = int_to_ptr.vmem [resolvable:$true] %s17_s10 }
   0x4   :  { %p66_p1 = scmp.lt.u32.totalorder %s62_s13, %s198_s0 }
   0x6   :  { %p68_p2 = pnand %p66_p1, %p63_p0 }
   0x8   :  { %71 = shalt.err (!%p68_p2)
}
   0x9   :  { %s72_s18 = scalar_lea.vmem %s18_s10, 16  ;;  %s76_s19 = scalar_lea.vmem %s18_s10, 32 }
   0xa   :  { %p73_p3 = scmp.ne.s32.totalorder %s18_s10, %s72_s18  ;;  %p77_p4 = scmp.lt.s32.totalorder %s18_s10, %s18_s10 }
   0xb   :  { %p78_p5 = scmp.lt.s32.totalorder %s76_s19, %s72_s18 }
   0xd   :  { %p79_p6 = por %p78_p5, %p77_p4 }
   0xf   :  { %p80_p7 = pnand %p79_p6, %p73_p3 }
  0x11   :  { %83 = shalt.err (!%p80_p7)
}
  0x12   :  { %20 = dma.hbm_to_vmem [thread:$0]  %s198_s0, 16, %s18_s10, [#allocation3]  }
  0x13   :  { %128 = dma.done.wait [#allocation3], 16  }
  0x14   :  { %129 = vsyncadd [#allocation3], 4294967280  ;;  %s135_s22 = smov [#allocation5]   ;;  %v24_v0 = vld [vmem:[#allocation2] sm:$0x1]  ;;  %vm26_vm0 = vcmask 24576  }
  0x15   :  { %s36_s23 = sshll.u32 %s135_s22, 4  ;;  %s136_s24 = smov [#allocation6]   ;;  %v25_v1 = vand.u32 2147483647, %v24_v0  ;;  %s37_s23 = int_to_ptr.vmem [resolvable:$true] %s36_s23 }
  0x16   :  { %s46_s25 = sshll.u32 %s136_s24, 4  ;;  %s84_s26 = scalar_lea.vmem %s37_s23, 16  ;;  %s165_s25 = int_to_ptr.vmem [resolvable:$true] %s46_s25 }
  0x17   :  { %27 = vst.msk [vmem:[#allocation5] sm:$0x1] %vm26_vm0, %v25_v1  ;;  %v28_v2 = vmul.f32 127.0, %v25_v1  ;;  %p85_p8 = scmp.ne.s32.totalorder %s37_s23, %s84_s26  ;;  %s88_s27 = scalar_lea.vmem %s37_s23, 32 }
  0x18   :  { %p89_p9 = scmp.lt.s32.totalorder %s37_s23, %s37_s23  ;;  %p90_p10 = scmp.lt.s32.totalorder %s88_s27, %s84_s26 }
  0x1a   :  { %p91_p11 = por %p90_p10, %p89_p9 }
  0x1c   :  { %p92_p12 = pnand %p91_p11, %p85_p8 }
  0x1e   :  { %95 = shalt.err (!%p92_p12)
}
  0x1f   :  { %s96_s29 = scalar_lea.hbm %s199_s1, 16 }
  0x20   :  { %p97_p13 = scmp.ne.s32.totalorder %s199_s1, %s96_s29  ;;  %p100_p0 = scmp.lt.u32.totalorder %s96_s29, %s199_s1 }
  0x22   :  { %p102_p1 = pnand %p100_p0, %p97_p13 }
  0x24   :  { %105 = shalt.err (!%p102_p1)
}
  0x25   :  { %39 = dma.vmem_to_hbm [thread:$0]  %s37_s23, 16, %s199_s1, [#allocation4]   ;;  %29 = vst.msk [vmem:[#allocation6] sm:$0x1] %vm26_vm0, %v28_v2 }
  0x26   :  { %s106_s8 = scalar_lea.vmem %s165_s25, 16  ;;  %s110_s9 = scalar_lea.vmem %s165_s25, 32 }
  0x27   :  { %p107_p2 = scmp.ne.s32.totalorder %s165_s25, %s106_s8  ;;  %p111_p3 = scmp.lt.s32.totalorder %s165_s25, %s165_s25 }
  0x28   :  { %p112_p4 = scmp.lt.s32.totalorder %s110_s9, %s106_s8 }
  0x2a   :  { %p113_p5 = por %p112_p4, %p111_p3 }
  0x2c   :  { %p114_p6 = pnand %p113_p5, %p107_p2 }
  0x2e   :  { %117 = shalt.err (!%p114_p6)
}
  0x2f   :  { %s118_s12 = scalar_lea.hbm %s200_s2, 16 }
  0x30   :  { %p119_p7 = scmp.ne.s32.totalorder %s200_s2, %s118_s12  ;;  %p122_p8 = scmp.lt.u32.totalorder %s118_s12, %s200_s2 }
  0x32   :  { %p124_p9 = pnand %p122_p8, %p119_p7 }
  0x34   :  { %127 = shalt.err (!%p124_p9)
}
  0x35   :  { %49 = dma.vmem_to_hbm [thread:$0]  %s165_s25, 16, %s200_s2, [#allocation7]  }
  0x36   :  { %130 = dma.done.wait [#allocation4], 16  }
  0x37   :  { %131 = vsyncadd [#allocation4], 4294967280 }
  0x38   :  { %132 = dma.done.wait [#allocation7], 16  }
  0x39   :  { %133 = vsyncadd [#allocation7], 4294967280 }
  0x3a   :  { %56 = vsyncpa [#allocation3], 1 }
  0x3b   :  { %57 = vsyncpa [#allocation4], 1 }
  0x3c   :  { %58 = vsyncpa [#allocation7], 1 }

</bundles_post_ra>
